<compile_context>
chip_gen: v6e
topology: v6e:2x2x1
jax: 0.10.0
libtpu: 0.0.40
codegen_flags: <defaults>
</compile_context>

<pallas_src>
import jax
import jax.numpy as jnp
from jax.experimental import pallas as pl
from jax.experimental.pallas import tpu as pltpu


def attn_kernel(hidden_ref, enc_ref, w_ref, b_ref, out_ref):
    """One batch tile: score = enc . (hidden @ W) + hidden . bias ; softmax over S."""
    hidden = hidden_ref[...].astype(jnp.float32)      # (bb, H)
    w = w_ref[...]                                    # (H, 2H)  PyTorch layout, no .T
    bias = b_ref[...]                                 # (1, H)

    # Tiny per-tile work on the small operands (MXU for the (bb,H)x(H,2H) matmul).
    v = jnp.dot(hidden, w, preferred_element_type=jnp.float32)        # (bb, 2H)
    c = jnp.sum(hidden * bias, axis=1, keepdims=True)                 # (bb, 1)

    # Streaming contraction over the only big operand:
    #   score[b, s] = enc[b, s, :] . v[b, :] + c[b]
    # VPU multiply (sublane-broadcast of v over S) + XLU lane reduce; both sit in
    # their own bundle slots, so the loop stays HBM-bound.
    enc = enc_ref[...].astype(jnp.float32)                            # (bb, S, 2H)
    score = jnp.sum(enc * v[:, None, :], axis=2) + c                  # (bb, S)

    # Numerically stable softmax over the sequence axis (dim=1).
    score = score - jnp.max(score, axis=1, keepdims=True)
    e = jnp.exp(score)
    denom = jnp.sum(e, axis=1, keepdims=True)
    # approx=True would move the reciprocal fully onto the EUP slot, but exact is
    # kept to hold the 1e-5 reference tolerance (cost is negligible: (bb,1) vector).
    probs = e * pl.reciprocal(denom, approx=False)                    # (bb, S)

    out_ref[...] = probs.astype(out_ref.dtype)                        # lane-dense store


def _pick_batch_tile(B, S, two_h, itemsize=4, budget_bytes=8 * 1024 * 1024):
    """Batch tile: must equal B or be a multiple of 8 (sublane dim of the (bb, S)
    output block).  Choose the largest divisor of B whose double-buffered enc tile
    stays under a conservative VMEM budget (also safe on v7x's 64 MiB VMEM)."""
    if B <= 8:
        return B
    cands = [d for d in range(8, B + 1, 8) if B % d == 0]
    if not cands:
        return B
    best = cands[0]
    for d in cands:
        if d * S * two_h * itemsize <= budget_bytes:
            best = d
    return best


def attn_forward(hidden, encoder_outputs, weight, bias):
    """hidden: (B, H) f32, encoder_outputs: (B, S, 2H) f32,
       weight: (H, 2H) f32 (PyTorch nn.Linear layout), bias: (H,) f32.
       Returns (B, 1, S) f32 attention weights."""
    B, S, two_h = encoder_outputs.shape
    H = hidden.shape[1]
    b2d = bias.reshape(1, H)

    bb = _pick_batch_tile(B, S, two_h, encoder_outputs.dtype.itemsize)
    grid = (B // bb,)

    # TODO(synk): for very long S, split the full-S block over a second ("arbitrary")
    # grid axis with an online-softmax accumulator; not needed at these sizes.
    probs = pl.pallas_call(
        attn_kernel,
        out_shape=jax.ShapeDtypeStruct((B, S), jnp.float32),
        grid=grid,
        in_specs=[
            pl.BlockSpec((bb, H), lambda i: (i, 0)),
            pl.BlockSpec((bb, S, two_h), lambda i: (i, 0, 0)),
            pl.BlockSpec((H, two_h), lambda i: (0, 0)),   # grid-invariant: stays in VMEM
            pl.BlockSpec((1, H), lambda i: (0, 0)),        # grid-invariant: stays in VMEM
        ],
        out_specs=pl.BlockSpec((bb, S), lambda i: (i, 0)),
        compiler_params=pltpu.CompilerParams(
            dimension_semantics=("parallel",),
            vmem_limit_bytes=32 * 1024 * 1024,
        ),
    )(hidden, encoder_outputs, weight, b2d)

    # unsqueeze(1) outside the kernel so the kernel's store stays lane-dense.
    return probs[:, None, :]


if __name__ == "__main__":
    B, S, H = 2, 8, 32            # batch, seq_len, hidden_size
    key = jax.random.PRNGKey(0)
    k_h, k_e, k_w, k_b = jax.random.split(key, 4)

    hidden = jax.random.normal(k_h, (B, H), dtype=jnp.float32)
    encoder_outputs = jax.random.normal(k_e, (B, S, 2 * H), dtype=jnp.float32)

    # Deterministic nn.Linear(2H -> H) parameter init (PyTorch-style uniform bound).
    bound = 1.0 / jnp.sqrt(2.0 * H)
    weight = jax.random.uniform(k_w, (H, 2 * H), minval=-bound, maxval=bound,
                                dtype=jnp.float32)
    bias = jax.random.uniform(k_b, (H,), minval=-bound, maxval=bound,
                              dtype=jnp.float32)

    out = attn_forward(hidden, encoder_outputs, weight, bias)
    out = jax.block_until_ready(out)

    # Pure-JAX reference (original PyTorch formulation: Linear applied to enc).
    tmp_ref = jnp.einsum('bsd,hd->bsh', encoder_outputs, weight,
                         precision=jax.lax.Precision.HIGHEST) + bias
    score_ref = jnp.sum(hidden[:, None, :] * tmp_ref, axis=2)
    ref = jax.nn.softmax(score_ref, axis=1)[:, None, :]

    assert out.shape == (B, 1, S)
    assert jnp.allclose(out, ref, atol=1e-5, rtol=1e-5)
    print("KERNEL_OK")
</pallas_src>

<mosaic_0001>
module attributes {stable_mosaic.version = 11 : i64} {
  func.func @attn_kernel(%arg0: i32, %arg1: memref<2x32xf32, #tpu.memory_space<vmem>>, %arg2: memref<2x8x64xf32, #tpu.memory_space<vmem>>, %arg3: memref<32x64xf32, #tpu.memory_space<vmem>>, %arg4: memref<1x32xf32, #tpu.memory_space<vmem>>, %arg5: memref<2x8xf32, #tpu.memory_space<vmem>>) attributes {dimension_semantics = [#tpu.dimension_semantics<parallel>], iteration_bounds = array<i64: 1>, scalar_prefetch = 0 : i64, scratch_operands = 0 : i64, tpu.core_type = #tpu.core_type<tc>, window_params = [{transform_indices = @transform_0, window_bounds = array<i64: 2, 32>}, {transform_indices = @transform_1, window_bounds = array<i64: 2, 8, 64>}, {pipeline_mode = #tpu.pipeline_mode<synchronous>, transform_indices = @transform_2, window_bounds = array<i64: 32, 64>}, {pipeline_mode = #tpu.pipeline_mode<synchronous>, transform_indices = @transform_3, window_bounds = array<i64: 1, 32>}, {transform_indices = @transform_4, window_bounds = array<i64: 2, 8>}]} {
    %c0 = arith.constant 0 : index
    %c0_0 = arith.constant 0 : index
    %0 = vector.load %arg1[%c0, %c0_0] : memref<2x32xf32, #tpu.memory_space<vmem>>, vector<2x32xf32>
    %c0_1 = arith.constant 0 : index
    %c0_2 = arith.constant 0 : index
    %1 = vector.load %arg3[%c0_1, %c0_2] : memref<32x64xf32, #tpu.memory_space<vmem>>, vector<32x64xf32>
    %c0_3 = arith.constant 0 : index
    %c0_4 = arith.constant 0 : index
    %2 = vector.load %arg4[%c0_3, %c0_4] : memref<1x32xf32, #tpu.memory_space<vmem>>, vector<1x32xf32>
    %cst = arith.constant dense<0.000000e+00> : vector<2x64xf32>
    %3 = tpu.matmul %0, %1, %cst {dimension_numbers = #tpu.dot_dimension_numbers<[1], [0], [0], [1], [0, 0, 1, 1], [], []>} : vector<2x32xf32>, vector<32x64xf32>, vector<2x64xf32> -> vector<2x64xf32>
    %4 = vector.broadcast %2 : vector<1x32xf32> to vector<2x32xf32>
    %5 = arith.mulf %0, %4 : vector<2x32xf32>
    %cst_5 = arith.constant dense<0.000000e+00> : vector<2xf32>
    %6 = vector.multi_reduction <add>, %5, %cst_5 [1] : vector<2x32xf32> to vector<2xf32>
    %7 = vector.shape_cast %6 : vector<2xf32> to vector<2x1xf32>
    %c0_6 = arith.constant 0 : index
    %c0_7 = arith.constant 0 : index
    %c0_8 = arith.constant 0 : index
    %8 = vector.load %arg2[%c0_6, %c0_7, %c0_8] : memref<2x8x64xf32, #tpu.memory_space<vmem>>, vector<2x8x64xf32>
    %9 = vector.shape_cast %3 : vector<2x64xf32> to vector<2x1x64xf32>
    %10 = vector.broadcast %9 : vector<2x1x64xf32> to vector<2x8x64xf32>
    %11 = arith.mulf %8, %10 : vector<2x8x64xf32>
    %cst_9 = arith.constant dense<0.000000e+00> : vector<2x8xf32>
    %12 = vector.multi_reduction <add>, %11, %cst_9 [2] : vector<2x8x64xf32> to vector<2x8xf32>
    %13 = vector.broadcast %7 : vector<2x1xf32> to vector<2x8xf32>
    %14 = arith.addf %12, %13 : vector<2x8xf32>
    %cst_10 = arith.constant dense<0xFF800000> : vector<2xf32>
    %15 = vector.multi_reduction <maximumf>, %14, %cst_10 [1] : vector<2x8xf32> to vector<2xf32>
    %16 = vector.shape_cast %15 : vector<2xf32> to vector<2x1xf32>
    %17 = vector.broadcast %16 : vector<2x1xf32> to vector<2x8xf32>
    %18 = arith.subf %14, %17 : vector<2x8xf32>
    %19 = math.exp %18 : vector<2x8xf32>
    %cst_11 = arith.constant dense<0.000000e+00> : vector<2xf32>
    %20 = vector.multi_reduction <add>, %19, %cst_11 [1] : vector<2x8xf32> to vector<2xf32>
    %21 = vector.shape_cast %20 : vector<2xf32> to vector<2x1xf32>
    %22 = tpu.reciprocal %21 : vector<2x1xf32> -> vector<2x1xf32>
    %23 = vector.broadcast %22 : vector<2x1xf32> to vector<2x8xf32>
    %24 = arith.mulf %19, %23 : vector<2x8xf32>
    %c0_12 = arith.constant 0 : index
    %c0_13 = arith.constant 0 : index
    %25 = vector.load %arg5[%c0_12, %c0_13] : memref<2x8xf32, #tpu.memory_space<vmem>>, vector<2x8xf32>
    tpu.vector_store %arg5[%c0_12, %c0_13], %24 {strides = array<i32>} : memref<2x8xf32, #tpu.memory_space<vmem>>, vector<2x8xf32>,
    return
  }
  func.func @transform_0(%arg0: i32) -> (i32, i32) {
    %c0_i32 = arith.constant 0 : i32
    %c0_i32_0 = arith.constant 0 : i32
    return %arg0, %c0_i32 : i32, i32
  }
  func.func @transform_1(%arg0: i32) -> (i32, i32, i32) {
    %c0_i32 = arith.constant 0 : i32
    %c0_i32_0 = arith.constant 0 : i32
    %c0_i32_1 = arith.constant 0 : i32
    return %arg0, %c0_i32, %c0_i32_0 : i32, i32, i32
  }
  func.func @transform_2(%arg0: i32) -> (i32, i32) {
    %c0_i32 = arith.constant 0 : i32
    %c0_i32_0 = arith.constant 0 : i32
    %c0_i32_1 = arith.constant 0 : i32
    return %c0_i32, %c0_i32_0 : i32, i32
  }
  func.func @transform_3(%arg0: i32) -> (i32, i32) {
    %c0_i32 = arith.constant 0 : i32
    %c0_i32_0 = arith.constant 0 : i32
    %c0_i32_1 = arith.constant 0 : i32
    return %c0_i32, %c0_i32_0 : i32, i32
  }
  func.func @transform_4(%arg0: i32) -> (i32, i32) {
    %c0_i32 = arith.constant 0 : i32
    %c0_i32_0 = arith.constant 0 : i32
    return %arg0, %c0_i32 : i32, i32
  }
}

</mosaic_0001>

<bundles_post_ra>
// kernel: tpu_custom_call.1
= control target key start
LH: loop header
LB: loop body
LE: loop exit
PB: predicated region body
PF: predicated region fallthrough
CT: control target
= control target key end

     0   :  { %9 = vsyncpa [#allocation3], 0  ;;  %s502_s0 = inlined_call_operand.hbm [shape: f32[2,32], index: 0, kind: input, shape index: {}]   ;;  %s503_s1 = inlined_call_operand.hbm [shape: f32[2,8,64], index: 1, kind: input, shape index: {}]   ;;  %s504_s2 = inlined_call_operand.hbm [shape: f32[32,64], index: 2, kind: input, shape index: {}]   ;;  %s505_s3 = inlined_call_operand.vmem [shape: f32[1,32], index: 3, kind: input, shape index: {}]   ;;  %s506_s4 = inlined_call_operand.hbm [shape: f32[2,8], index: 4, kind: output, shape index: {}]  }
   0x1   :  { %10 = vsyncpa [#allocation6], 0 }
   0x2   :  { %11 = vsyncpa [#allocation4], 0  ;;  %s439_s15 = smov [#allocation5]  }
   0x3   :  { %s27_s16 = sshll.u32 %s439_s15, 4  ;;  %s28_s16 = int_to_ptr.vmem [resolvable:$true] %s27_s16 }
   0x4   :  { %s361_s17 = scalar_lea.vmem %s28_s16, 256  ;;  %p366_p1 = scmp.lt.s32.totalorder %s28_s16, %s28_s16 }
   0x5   :  { %p362_p0 = scmp.ne.s32.totalorder %s28_s16, %s361_s17  ;;  %p367_p2 = scmp.lt.s32.totalorder %s361_s17, %s361_s17 }
   0x7   :  { %p368_p3 = por %p367_p2, %p366_p1 }
   0x9   :  { %p369_p4 = pnand %p368_p3, %p362_p0 }
   0xb   :  { %372 = shalt.err (!%p369_p4)
}
   0xc   :  { %s440_s18 = smov 128   ;;  %s441_s19 = smov 8  }
   0xd   :  { %33 = dma.hbm_to_vmem [thread:$0]  %s503_s1, 256, %s28_s16, [#allocation6], %s440_s18, %s440_s18, %s441_s19  }
   0xe   :  { %s442_s22 = smov [#allocation2]   ;;  %s443_s24 = smov [#allocation7]  }
   0xf   :  { %s18_s23 = sshll.u32 %s442_s22, 4  ;;  %s39_s25 = sshll.u32 %s443_s24, 4  ;;  %s19_s23 = int_to_ptr.vmem [resolvable:$true] %s18_s23  ;;  %s40_s25 = int_to_ptr.vmem [resolvable:$true] %s39_s25 }
  0x10   :  { %s381_s26 = scalar_lea.vmem %s19_s23, 32  ;;  %p386_p6 = scmp.lt.s32.totalorder %s19_s23, %s19_s23 }
  0x11   :  { %p382_p5 = scmp.ne.s32.totalorder %s19_s23, %s381_s26  ;;  %p387_p7 = scmp.lt.s32.totalorder %s381_s26, %s381_s26 }
  0x13   :  { %p388_p8 = por %p387_p7, %p386_p6 }
  0x15   :  { %p389_p9 = pnand %p388_p8, %p382_p5 }
  0x17   :  { %392 = shalt.err (!%p389_p9)
}
  0x18   :  { %21 = dma.hbm_to_vmem [thread:$0]  %s502_s0, 32, %s19_s23, [#allocation3]  }
  0x19   :  { %s401_s29 = scalar_lea.vmem %s40_s25, 512  ;;  %p406_p11 = scmp.lt.s32.totalorder %s40_s25, %s40_s25 }
  0x1a   :  { %p402_p10 = scmp.ne.s32.totalorder %s40_s25, %s401_s29  ;;  %p407_p12 = scmp.lt.s32.totalorder %s401_s29, %s401_s29 }
  0x1c   :  { %p408_p13 = por %p407_p12, %p406_p11 }
  0x1e   :  { %p409_p0 = pnand %p408_p13, %p402_p10 }
  0x20   :  { %412 = shalt.err (!%p409_p0)
}
  0x21   :  { %45 = dma.hbm_to_vmem [thread:$0]  %s504_s2, 512, %s40_s25, [#allocation6], %s440_s18, %s440_s18, %s441_s19  }
  0x22   :  { %433 = dma.done.wait [#allocation3], 32  }
  0x23   :  { %434 = vsyncadd [#allocation3], 4294967264 }
  0x24   :  { %435 = dma.done.wait [#allocation6], 768  }
  0x25   :  { %436 = vsyncadd [#allocation6], 4294966528  ;;  %v444_v0 = vmov 0.0   ;;  %vm445_vm0 = vmmov 0   ;;  %v61_v1 = vld [vmem:[#allocation7 + $0x18] sm:$0xff]  ;;  %v60_v2 = vld [vmem:[#allocation7 + $0x10] sm:$0xff]  ;;  %v154_v11 = vlaneseq }
  0x26   :  { %324 = vmatprep.subr.mxu0 %v444_v0  ;;  %332 = vmatprep.mubr.msk.f32.mxu0 %vm445_vm0, %v444_v0  ;;  %v59_v3 = vld [vmem:[#allocation7 + $0x8] sm:$0xff]  ;;  %v58_v4 = vld [vmem:[#allocation7] sm:$0xff]  ;;  %vm63_vm1 = vcmask 261120   ;;  %vm144_vm2 = vcmask 254976   ;;  %v446_v9 = vmov 1966171168  }
  0x27   :  { %325 = vmatpush3.msra.mxu0 %v61_v1  ;;  %v57_v5 = vld [vmem:[#allocation2] sm:$0x3]  ;;  %v152_v10 = vunpack.c.l.s4 %v446_v9  ;;  %v155_v13 = vshrl.u32 %v154_v11, 7  ;;  %v148_v21 = vld [vmem:[#allocation5] sm:$0xff]  ;;  %vm185_vm3 = vcmask 523264   ;;  %v149_v24 = vld [vmem:[#allocation5 + $0x8] sm:$0xff] }
  0x28   :  { %326 = vmatprep.subr.mxu0 %v444_v0  ;;  %v318_v6 = vld [vmem:[%s505_s3] ss:$0 sm:$0xff]  ;;  %v447_v30 = vmov 0   ;;  %v214_v39 = vand.u32 127, %v154_v11  ;;  %vm223_vm4 = vcmask 1041409   ;;  %vm226_vm5 = vcmask 58368  }
  0x29   :  { %327 = vmatpush3.msra.mxu0 %v60_v2  ;;  %v143_v7 = vmul.f32 %v318_v6, %v57_v5  ;;  %v153_v12 = vunpack.c.0.s8 %v152_v10  ;;  %v486_v17 = vsub.s32 0, %v155_v13  ;;  %345 = vset.pattern.permute.xlu1 %v447_v30  ;;  %v199_v32 = vsub.s32 1, %v155_v13  ;;  %s448_s3 = smov [#allocation8]  }
  0x2a   :  { %328 = vmatprep.subr.mxu0 %v444_v0  ;;  %346 = vset.pattern.permute.xlu0 %v447_v30  ;;  %v217_v40 = vsub.s32 %v214_v39, %v155_v13  ;;  %s307_s5 = sshll.u32 %s448_s3, 4  ;;  %s308_s5 = int_to_ptr.vmem [resolvable:$true] %s307_s5 }
  0x2b   :  { %329 = vmatpush3.msra.mxu0 %v59_v3  ;;  %v145_v8 = vsel %vm144_vm2, %v143_v7, 0.0  ;;  %v156_v14 = vsub.s32 %v153_v12, %v155_v13  ;;  %s413_s6 = scalar_lea.vmem %s308_s5, 32  ;;  %p418_p2 = scmp.lt.s32.totalorder %s308_s5, %s308_s5 }
  0x2c   :  { %330 = vmatprep.subr.mxu0 %v444_v0  ;;  %146 = vadd.xlane.f32.xlu0 %v145_v8  ;;  %p414_p1 = scmp.ne.s32.totalorder %s308_s5, %s413_s6  ;;  %p419_p3 = scmp.lt.s32.totalorder %s413_s6, %s413_s6 }
  0x2d   :  { %331 = vmatpush3.msra.mxu0 %v58_v4 }
  0x2e   :  { %333 = vmatmul.mubr.msk.f32.vlgmr.msra.gmra.mxu0 %vm63_vm1, %v57_v5  ;;  %p420_p4 = por %p419_p3, %p418_p2 }
  0x30   :  { %p421_p5 = pnand %p420_p4, %p414_p1 }
  0xb5   :  { %v147_v31 = vpop.xlane.xlu0 %146 }
  0xb6   :  { %v196_v33 = vrot.slane %v147_v31, %v486_v17  ;;  %v200_v35 = vrot.slane %v147_v31, %v199_v32 }
  0xee   :  { %v133_v15 = vpop.f32.mrf.mxu0 }
  0xef   :  { %v157_v16 = vrot.slane %v133_v15, %v156_v14 }
  0xf0   :  { %v334_v18 = vpop.f32.mrf.mxu0 }
  0xf1   :  { %v158_v19 = vcombine.high %v157_v16, %v157_v16  ;;  %v165_v20 = vrot.slane %v157_v16, %v156_v14 }
  0xf3   :  { %v172_v22 = vrot.slane %v158_v19, %v156_v14  ;;  %v176_v23 = vrot.slane %v165_v20, %v486_v17 }
  0xf5   :  { %v183_v25 = vmul.f32 %v176_v23, %v148_v21  ;;  %v180_v26 = vrot.slane %v172_v22, %v486_v17 }
  0xf7   :  { %v186_v27 = vsel %vm185_vm3, %v183_v25, 0.0  ;;  %v184_v28 = vmul.f32 %v180_v26, %v149_v24 }
  0xf8   :  { %187 = vadd.xlane.f32.xlu0 %v186_v27 }
  0xf9   :  { %v189_v29 = vsel %vm185_vm3, %v184_v28, 0.0 }
  0xfa   :  { %190 = vadd.xlane.f32.xlu1 %v189_v29 }
 0x181   :  { %v188_v34 = vpop.xlane.xlu0 %187 }
 0x182   :  { %v203_v36 = vadd.f32 %v196_v33, %v188_v34 }
 0x183   :  { %v191_v37 = vpop.xlane.xlu1 %190 }
 0x184   :  { %v204_v38 = vadd.f32 %v200_v35, %v191_v37  ;;  %208 = vperm.xlu1 %345, %v203_v36  }
 0x186   :  { %211 = vperm.xlu0 %346, %v204_v38  }
 0x1ff   :  { %v209_v41 = vpop.permute.xlu1 %208 }
 0x200   :  { %v218_v43 = vrot.slane %v209_v41, %v217_v40 }
 0x201   :  { %v212_v42 = vpop.permute.xlu0 %211 }
 0x202   :  { %v222_v44 = vrot.slane %v212_v42, %v217_v40 }
 0x204   :  { %v224_v45 = vsel %vm223_vm4, %v222_v44, %v218_v43 }
 0x205   :  { %v227_v46 = vsel %vm226_vm5, %v224_v45, -inf }
 0x206   :  { %228 = vmax.xlane.f32.xlu1 %v227_v46 }
 0x28f   :  { %v229_v47 = vpop.xlane.xlu1 %228 }
 0x290   :  { %v234_v48 = vrot.slane %v229_v47, %v486_v17  ;;  %v238_v49 = vrot.slane %v229_v47, %v199_v32 }
 0x292   :  { %v241_v50 = vsub.f32 %v203_v36, %v234_v48  ;;  %v242_v51 = vsub.f32 %v204_v38, %v238_v49 }
 0x294   :  { %v243_v52 = vmul.f32 1.442695, %v241_v50  ;;  %v245_v53 = vmul.f32 1.442695, %v242_v51 }
 0x296   :  { %347 = vpow2.f32 %v243_v52 }
 0x297   :  { %349 = vpow2.f32 %v245_v53 }
 0x2a3   :  { %v348_v54 = vpop.eup %347 }
 0x2a4   :  { %250 = vperm.xlu0 %346, %v348_v54   ;;  %v350_v55 = vpop.eup %349 }
 0x2a8   :  { %253 = vperm.xlu0 %346, %v350_v55  }
 0x31f   :  { %v251_v56 = vpop.permute.xlu0 %250 }
 0x320   :  { %v258_v58 = vrot.slane %v251_v56, %v217_v40 }
 0x323   :  { %v254_v57 = vpop.permute.xlu0 %253 }
 0x324   :  { %v262_v59 = vrot.slane %v254_v57, %v217_v40 }
 0x326   :  { %v263_v60 = vsel %vm223_vm4, %v262_v59, %v258_v58 }
 0x327   :  { %v265_v61 = vsel %vm226_vm5, %v263_v60, 0.0 }
 0x328   :  { %266 = vadd.xlane.f32.xlu1 %v265_v61 }
 0x3b1   :  { %v267_v62 = vpop.xlane.xlu1 %266 }
 0x3b2   :  { %351 = vrcp.f32 %v267_v62 }
 0x3bf   :  { %v352_v63 = vpop.eup %351 }
 0x3c0   :  { %v277_v0 = vrot.slane %v352_v63, %v199_v32  ;;  %v273_v1 = vrot.slane %v352_v63, %v486_v17 }
 0x3c2   :  { %v281_v2 = vmul.f32 %v350_v55, %v277_v0  ;;  %v280_v3 = vmul.f32 %v348_v54, %v273_v1 }
 0x3c4   :  { %288 = vperm.xlu1 %345, %v281_v2   ;;  %285 = vperm.xlu0 %346, %v280_v3  }
 0x43f   :  { %v289_v4 = vpop.permute.xlu1 %288  ;;  %v286_v5 = vpop.permute.xlu0 %285 }
 0x440   :  { %v297_v6 = vrot.slane %v289_v4, %v217_v40  ;;  %v293_v7 = vrot.slane %v286_v5, %v217_v40 }
 0x442   :  { %v298_v8 = vsel %vm223_vm4, %v297_v6, %v293_v7 }
 0x443   :  { %300 = vst.msk [vmem:[#allocation8] sm:$0x3] %vm226_vm5, %v298_v8 }
 0x444   :  { %424 = shalt.err (!%p421_p5)
}
 0x445   :  { %310 = dma.vmem_to_hbm [thread:$0]  %s308_s5, 32, %s506_s4, [#allocation4]  }
 0x446   :  { %437 = dma.done.wait [#allocation4], 32  }
 0x447   :  { %438 = vsyncadd [#allocation4], 4294967264 }
 0x448   :  { %314 = vsyncpa [#allocation3], 1 }
 0x449   :  { %315 = vsyncpa [#allocation6], 1 }
 0x44a   :  { %316 = vsyncpa [#allocation4], 1 }

</bundles_post_ra>
